<compile_context>
chip_gen: v7x
topology: tpu7x:2x2x1
jax: 0.10.0
libtpu: 0.0.40
codegen_flags: <defaults>
</compile_context>

<pallas_src>
import functools

import jax
import jax.numpy as jnp
from jax.experimental import pallas as pl
from jax.experimental.pallas import tpu as pltpu


# --------------------------------------------------------------------------
# Kernels
# --------------------------------------------------------------------------

def _adailn_single_kernel(x_ref, gamma_ref, beta_ref, rho_ref, o_ref, *, eps):
    # x_ref:                 (1, C, HW) block for the current batch element
    # gamma/beta/rho refs:   (1, C, 1)  (C on the sublane axis, no reshape)
    C = x_ref.shape[1]
    HW = x_ref.shape[2]
    n_hw = jnp.float32(HW)
    n_chw = jnp.float32(C * HW)

    # ---- Fused statistics sweep: s1 and s2 in a single pass over the block ----
    xs = x_ref[...].astype(jnp.float32)                       # stats-sweep copy
    s1 = jnp.sum(xs, axis=2, keepdims=True)                   # (1, C, 1)
    s2 = jnp.sum(xs * xs, axis=2, keepdims=True)               # (1, C, 1)

    in_mean = s1 * (1.0 / n_hw)                                # (1, C, 1)
    in_ss = jnp.maximum(s2 - s1 * in_mean, 0.0)                # centered sum-sq
    in_var = in_ss * (1.0 / (n_hw - 1.0))                      # ddof=1

    # ---- LN statistics from the per-channel partials (no second full pass) ----
    ln_mean = jnp.sum(s1, axis=1, keepdims=True) * (1.0 / n_chw)          # (1,1,1)
    ln_ss = jnp.maximum(
        jnp.sum(s2, axis=1, keepdims=True) - n_chw * ln_mean * ln_mean, 0.0)
    ln_var = ln_ss * (1.0 / (n_chw - 1.0))                                # ddof=1

    in_inv = jax.lax.rsqrt(in_var + eps)                        # (1, C, 1)
    ln_inv = jax.lax.rsqrt(ln_var + eps)                        # (1, 1, 1)

    # ---- Fold rho-blend + affine into one per-channel scale/offset ----
    rho = rho_ref[...].astype(jnp.float32)                      # (1, C, 1)
    gamma = gamma_ref[...].astype(jnp.float32)                  # (1, C, 1)
    beta = beta_ref[...].astype(jnp.float32)                    # (1, C, 1)

    blend_inv = rho * in_inv + (1.0 - rho) * ln_inv
    blend_mu = rho * (in_mean * in_inv) + (1.0 - rho) * (ln_mean * ln_inv)
    scale = gamma * blend_inv
    offset = beta - gamma * blend_mu

    # Apply sweep: re-read x so the stats-sweep f32 slab need not stay live.
    o_ref[...] = (x_ref[...].astype(jnp.float32) * scale + offset).astype(o_ref.dtype)


def _adailn_stats_kernel(x_ref, s_ref):
    # Pass 1 of the two-pass path.
    # x_ref: (1, C, chunk) block;  s_ref: (1, C, 2) accumulator (s1, s2),
    # resident across the (arbitrary) chunk axis.
    @pl.when(pl.program_id(1) == 0)
    def _():
        s_ref[...] = jnp.zeros_like(s_ref)

    xf = x_ref[...].astype(jnp.float32)                         # (1, C, chunk)
    s1 = jnp.sum(xf, axis=2, keepdims=True)                     # (1, C, 1)
    s2 = jnp.sum(xf * xf, axis=2, keepdims=True)                # (1, C, 1)
    s_ref[:, :, 0:1] = s_ref[:, :, 0:1] + s1
    s_ref[:, :, 1:2] = s_ref[:, :, 1:2] + s2


def _adailn_apply_kernel(x_ref, scale_ref, offset_ref, o_ref):
    # Pass 2 of the two-pass path: one FMA per element.
    # x_ref: (1, C, chunk); scale/offset: (1, C, 1) f32.
    o_ref[...] = (x_ref[...].astype(jnp.float32) * scale_ref[...]
                  + offset_ref[...]).astype(o_ref.dtype)


# --------------------------------------------------------------------------
# Host-side helpers
# --------------------------------------------------------------------------

def _vmem_budget_bytes():
    """Usable per-call VMEM budget: physical capacity minus compiler headroom."""
    try:
        cap = int(pltpu.get_tpu_info().vmem_capacity_bytes)
    except Exception:
        cap = 0
    if cap <= 0:
        cap = 64 * 1024 * 1024      # safe minimum (v7x per-TensorCore VMEM)
    headroom = 16 * 1024 * 1024
    return max(32 * 1024 * 1024, cap - headroom)


def _pick_chunk(HW, max_chunk):
    """Largest divisor of HW <= max_chunk, preferring multiples of 128 lanes."""
    max_chunk = max(1, min(HW, int(max_chunk)))
    best = 1
    for c in range(max_chunk, 0, -1):
        if HW % c == 0:
            if c % 128 == 0:
                return c
            if best == 1:
                best = c
    return best


def _fold_scale_offset(stats, gamma, beta, rho2, HW, C, eps):
    """Plain-JAX combine on the small (B, C) statistics -> per-channel scale/offset."""
    s1 = stats[:, :, 0]                                         # (B, C)
    s2 = stats[:, :, 1]                                         # (B, C)
    n_hw = jnp.float32(HW)
    n_chw = jnp.float32(C * HW)

    in_mean = s1 / n_hw
    in_var = jnp.maximum(s2 - s1 * in_mean, 0.0) / (n_hw - 1.0)

    ln_mean = jnp.sum(s1, axis=1, keepdims=True) / n_chw        # (B, 1)
    ln_var = jnp.maximum(
        jnp.sum(s2, axis=1, keepdims=True) - n_chw * ln_mean * ln_mean,
        0.0) / (n_chw - 1.0)

    in_inv = jax.lax.rsqrt(in_var + eps)
    ln_inv = jax.lax.rsqrt(ln_var + eps)

    g = gamma.astype(jnp.float32)
    b = beta.astype(jnp.float32)
    r = rho2.astype(jnp.float32)                                # (1, C)

    blend_inv = r * in_inv + (1.0 - r) * ln_inv
    blend_mu = r * (in_mean * in_inv) + (1.0 - r) * (ln_mean * ln_inv)
    scale = g * blend_inv
    offset = b - g * blend_mu
    return scale, offset                                        # (B, C) each


# --------------------------------------------------------------------------
# Wrappers
# --------------------------------------------------------------------------

def _ada_iln_single_pass(x2, gamma, beta, rho2, eps, budget):
    B, C, HW = x2.shape
    itemsize = jnp.dtype(x2.dtype).itemsize
    blk_bytes = C * HW * itemsize
    # 2x double-buffered input + 2x output + stats-sweep f32 temporaries + slack.
    est = 4 * blk_bytes + 2 * C * HW * 4 + (2 << 20)
    vmem_limit = int(min(budget, max(32 << 20, est)))

    gamma3 = gamma.reshape(B, C, 1)
    beta3 = beta.reshape(B, C, 1)
    rho3 = rho2.reshape(1, C, 1)

    kernel = functools.partial(_adailn_single_kernel, eps=eps)
    return pl.pallas_call(
        kernel,
        out_shape=jax.ShapeDtypeStruct((B, C, HW), x2.dtype),
        grid_spec=pltpu.PrefetchScalarGridSpec(
            num_scalar_prefetch=0,
            grid=(B,),
            in_specs=[
                pl.BlockSpec((1, C, HW), lambda b: (b, 0, 0)),
                pl.BlockSpec((1, C, 1), lambda b: (b, 0, 0)),
                pl.BlockSpec((1, C, 1), lambda b: (b, 0, 0)),
                pl.BlockSpec((1, C, 1), lambda b: (0, 0, 0)),
            ],
            out_specs=pl.BlockSpec((1, C, HW), lambda b: (b, 0, 0)),
        ),
        compiler_params=pltpu.CompilerParams(
            dimension_semantics=("parallel",),
            vmem_limit_bytes=vmem_limit,
        ),
    )(x2, gamma3, beta3, rho3)


def _ada_iln_two_pass(x2, gamma, beta, rho2, eps, chunk, budget):
    B, C, HW = x2.shape
    itemsize = jnp.dtype(x2.dtype).itemsize

    if chunk is None or int(chunk) <= 0 or HW % int(chunk) != 0:
        # Per-step VMEM of the apply pass ~ (2 in + 2 out) blocks + f32 temp.
        bytes_per_col = C * (4 * itemsize + 4)
        max_chunk = max(128, (budget - (4 << 20)) // bytes_per_col)
        chunk = _pick_chunk(HW, max_chunk)
    chunk = int(chunk)
    n_chunks = HW // chunk

    est_stats = 2 * C * chunk * itemsize + 2 * C * chunk * 4 + (2 << 20)
    est_apply = 4 * C * chunk * itemsize + 2 * C * chunk * 4 + (2 << 20)
    vmem_limit = int(min(budget, max(32 << 20, max(est_stats, est_apply))))

    # Pass 1: per-channel partial sums (s1, s2), accumulated across HW chunks.
    stats = pl.pallas_call(
        _adailn_stats_kernel,
        out_shape=jax.ShapeDtypeStruct((B, C, 2), jnp.float32),
        grid_spec=pltpu.PrefetchScalarGridSpec(
            num_scalar_prefetch=0,
            grid=(B, n_chunks),
            in_specs=[pl.BlockSpec((1, C, chunk), lambda b, k: (b, 0, k))],
            out_specs=pl.BlockSpec((1, C, 2), lambda b, k: (b, 0, 0)),
        ),
        compiler_params=pltpu.CompilerParams(
            dimension_semantics=("parallel", "arbitrary"),
            vmem_limit_bytes=vmem_limit,
        ),
    )(x2)

    # Combine (LN stats + rho blend + affine fold) in plain JAX on (B, C).
    scale, offset = _fold_scale_offset(stats, gamma, beta, rho2, HW, C, eps)
    scale3 = scale.reshape(B, C, 1)
    offset3 = offset.reshape(B, C, 1)

    # Pass 2: pure elementwise apply, both grid axes parallel (v7x dual-TC).
    return pl.pallas_call(
        _adailn_apply_kernel,
        out_shape=jax.ShapeDtypeStruct((B, C, HW), x2.dtype),
        grid_spec=pltpu.PrefetchScalarGridSpec(
            num_scalar_prefetch=0,
            grid=(B, n_chunks),
            in_specs=[
                pl.BlockSpec((1, C, chunk), lambda b, k: (b, 0, k)),
                pl.BlockSpec((1, C, 1), lambda b, k: (b, 0, 0)),
                pl.BlockSpec((1, C, 1), lambda b, k: (b, 0, 0)),
            ],
            out_specs=pl.BlockSpec((1, C, chunk), lambda b, k: (b, 0, k)),
        ),
        compiler_params=pltpu.CompilerParams(
            dimension_semantics=("parallel", "parallel"),
            vmem_limit_bytes=vmem_limit,
        ),
    )(x2, scale3, offset3)


def ada_iln(x, gamma, beta, rho, eps=1e-5, *, force_two_pass=False, chunk=None):
    """x: (B, C, H, W); gamma, beta: (B, C); rho: (1, C, 1, 1) or (1, C)."""
    B, C, H, W = x.shape
    HW = H * W
    x2 = x.reshape(B, C, HW)        # free view: H, W are contiguous in NCHW
    rho2 = rho.reshape(1, C)

    budget = _vmem_budget_bytes()
    itemsize = jnp.dtype(x.dtype).itemsize
    blk_bytes = C * HW * itemsize
    single_est = 4 * blk_bytes + 2 * C * HW * 4 + (2 << 20)

    use_two_pass = bool(force_two_pass) or single_est > budget
    # B == 1 has no batch pipelining: chunk the sample so DMA overlaps compute
    # and both v7x TensorCores get work on the parallel chunk axis.
    if B == 1 and HW % 128 == 0 and HW >= 2048:
        use_two_pass = True
    # TODO(synk): for B == 1 a manual-DMA streaming variant (single x read,
    # emit_pipeline over HW sub-chunks inside one grid step) would keep the
    # 1-read + 1-write HBM traffic while still overlapping DMA and compute.

    if use_two_pass:
        out = _ada_iln_two_pass(x2, gamma, beta, rho2, eps, chunk, budget)
    else:
        out = _ada_iln_single_pass(x2, gamma, beta, rho2, eps, budget)
    return out.reshape(B, C, H, W)


# --------------------------------------------------------------------------
# Reference + test
# --------------------------------------------------------------------------

def _reference(x, gamma, beta, rho, eps=1e-5):
    x = x.astype(jnp.float32)
    in_mean = jnp.mean(x, axis=(2, 3), keepdims=True)
    in_var = jnp.var(x, axis=(2, 3), keepdims=True, ddof=1)
    out_in = (x - in_mean) / jnp.sqrt(in_var + eps)
    ln_mean = jnp.mean(x, axis=(1, 2, 3), keepdims=True)
    ln_var = jnp.var(x, axis=(1, 2, 3), keepdims=True, ddof=1)
    out_ln = (x - ln_mean) / jnp.sqrt(ln_var + eps)
    out = rho * out_in + (1.0 - rho) * out_ln
    return out * gamma[:, :, None, None] + beta[:, :, None, None]


if __name__ == "__main__":
    B, C, H, W = 2, 4, 16, 16
    key = jax.random.PRNGKey(0)
    kx, kg, kb = jax.random.split(key, 3)

    x = jax.random.normal(kx, (B, C, H, W), dtype=jnp.float32)
    gamma = jax.random.normal(kg, (B, C), dtype=jnp.float32)
    beta = jax.random.normal(kb, (B, C), dtype=jnp.float32)
    # Parameter init exactly as in adaILN.__init__: rho filled with 0.9.
    rho = jnp.full((1, C, 1, 1), 0.9, dtype=jnp.float32)

    ref = _reference(x, gamma, beta, rho)

    # Default path (single-pass resident block at this small size).
    out = jax.block_until_ready(ada_iln(x, gamma, beta, rho))
    assert out.shape == (B, C, H, W)
    assert jnp.allclose(out, ref, atol=1e-4, rtol=1e-4), "single-pass mismatch"

    # Two-pass HW-chunked path (auto-selected for large maps / B == 1 / v7x);
    # force it here with 2 chunks per sample to validate the accumulation grid.
    out2 = jax.block_until_ready(
        ada_iln(x, gamma, beta, rho, force_two_pass=True, chunk=128))
    assert out2.shape == (B, C, H, W)
    assert jnp.allclose(out2, ref, atol=1e-4, rtol=1e-4), "two-pass mismatch"

    print("KERNEL_OK")
</pallas_src>

<mosaic_0001>
module attributes {stable_mosaic.version = 11 : i64} {
  func.func @_adailn_single_kernel(%arg0: i32, %arg1: memref<1x4x256xf32, #tpu.memory_space<vmem>>, %arg2: memref<1x4x1xf32, #tpu.memory_space<vmem>>, %arg3: memref<1x4x1xf32, #tpu.memory_space<vmem>>, %arg4: memref<1x4x1xf32, #tpu.memory_space<vmem>>, %arg5: memref<1x4x256xf32, #tpu.memory_space<vmem>>) attributes {dimension_semantics = [#tpu.dimension_semantics<parallel>], iteration_bounds = array<i64: 2>, scalar_prefetch = 0 : i64, scratch_operands = 0 : i64, tpu.core_type = #tpu.core_type<tc>, window_params = [{transform_indices = @transform_0, window_bounds = array<i64: 1, 4, 256>}, {transform_indices = @transform_1, window_bounds = array<i64: 1, 4, 1>}, {transform_indices = @transform_2, window_bounds = array<i64: 1, 4, 1>}, {pipeline_mode = #tpu.pipeline_mode<synchronous>, transform_indices = @transform_3, window_bounds = array<i64: 1, 4, 1>}, {transform_indices = @transform_4, window_bounds = array<i64: 1, 4, 256>}]} {
    %c0 = arith.constant 0 : index
    %c0_0 = arith.constant 0 : index
    %c0_1 = arith.constant 0 : index
    %0 = vector.load %arg1[%c0, %c0_0, %c0_1] : memref<1x4x256xf32, #tpu.memory_space<vmem>>, vector<1x4x256xf32>
    %cst = arith.constant dense<0.000000e+00> : vector<1x4xf32>
    %1 = vector.multi_reduction <add>, %0, %cst [2] : vector<1x4x256xf32> to vector<1x4xf32>
    %2 = vector.shape_cast %1 : vector<1x4xf32> to vector<1x4x1xf32>
    %3 = arith.mulf %0, %0 : vector<1x4x256xf32>
    %cst_2 = arith.constant dense<0.000000e+00> : vector<1x4xf32>
    %4 = vector.multi_reduction <add>, %3, %cst_2 [2] : vector<1x4x256xf32> to vector<1x4xf32>
    %5 = vector.shape_cast %4 : vector<1x4xf32> to vector<1x4x1xf32>
    %cst_3 = arith.constant 1.000000e+00 : f32
    %cst_4 = arith.constant 2.560000e+02 : f32
    %6 = arith.divf %cst_3, %cst_4 : f32
    %7 = vector.broadcast %6 : f32 to vector<1x4x1xf32>
    %8 = arith.mulf %2, %7 : vector<1x4x1xf32>
    %9 = arith.mulf %2, %8 : vector<1x4x1xf32>
    %10 = arith.subf %5, %9 : vector<1x4x1xf32>
    %cst_5 = arith.constant 0.000000e+00 : f32
    %11 = vector.broadcast %cst_5 : f32 to vector<1x4x1xf32>
    %12 = arith.maximumf %10, %11 : vector<1x4x1xf32>
    %cst_6 = arith.constant 2.560000e+02 : f32
    %cst_7 = arith.constant 1.000000e+00 : f32
    %13 = arith.subf %cst_6, %cst_7 : f32
    %cst_8 = arith.constant 1.000000e+00 : f32
    %14 = arith.divf %cst_8, %13 : f32
    %15 = vector.broadcast %14 : f32 to vector<1x4x1xf32>
    %16 = arith.mulf %12, %15 : vector<1x4x1xf32>
    %cst_9 = arith.constant dense<0.000000e+00> : vector<1x1xf32>
    %17 = vector.multi_reduction <add>, %2, %cst_9 [1] : vector<1x4x1xf32> to vector<1x1xf32>
    %18 = vector.shape_cast %17 : vector<1x1xf32> to vector<1x1x1xf32>
    %cst_10 = arith.constant 1.000000e+00 : f32
    %cst_11 = arith.constant 1.024000e+03 : f32
    %19 = arith.divf %cst_10, %cst_11 : f32
    %20 = vector.broadcast %19 : f32 to vector<1x1x1xf32>
    %21 = arith.mulf %18, %20 : vector<1x1x1xf32>
    %cst_12 = arith.constant dense<0.000000e+00> : vector<1x1xf32>
    %22 = vector.multi_reduction <add>, %5, %cst_12 [1] : vector<1x4x1xf32> to vector<1x1xf32>
    %23 = vector.shape_cast %22 : vector<1x1xf32> to vector<1x1x1xf32>
    %cst_13 = arith.constant 1.024000e+03 : f32
    %24 = vector.broadcast %cst_13 : f32 to vector<1x1x1xf32>
    %25 = arith.mulf %24, %21 : vector<1x1x1xf32>
    %26 = arith.mulf %25, %21 : vector<1x1x1xf32>
    %27 = arith.subf %23, %26 : vector<1x1x1xf32>
    %cst_14 = arith.constant 0.000000e+00 : f32
    %28 = vector.broadcast %cst_14 : f32 to vector<1x1x1xf32>
    %29 = arith.maximumf %27, %28 : vector<1x1x1xf32>
    %cst_15 = arith.constant 1.024000e+03 : f32
    %cst_16 = arith.constant 1.000000e+00 : f32
    %30 = arith.subf %cst_15, %cst_16 : f32
    %cst_17 = arith.constant 1.000000e+00 : f32
    %31 = arith.divf %cst_17, %30 : f32
    %32 = vector.broadcast %31 : f32 to vector<1x1x1xf32>
    %33 = arith.mulf %29, %32 : vector<1x1x1xf32>
    %cst_18 = arith.constant 9.99999974E-6 : f32
    %34 = vector.broadcast %cst_18 : f32 to vector<1x4x1xf32>
    %35 = arith.addf %16, %34 : vector<1x4x1xf32>
    %36 = math.rsqrt %35 : vector<1x4x1xf32>
    %cst_19 = arith.constant 9.99999974E-6 : f32
    %37 = vector.broadcast %cst_19 : f32 to vector<1x1x1xf32>
    %38 = arith.addf %33, %37 : vector<1x1x1xf32>
    %39 = math.rsqrt %38 : vector<1x1x1xf32>
    %c0_20 = arith.constant 0 : index
    %c0_21 = arith.constant 0 : index
    %c0_22 = arith.constant 0 : index
    %40 = vector.load %arg4[%c0_20, %c0_21, %c0_22] : memref<1x4x1xf32, #tpu.memory_space<vmem>>, vector<1x4x1xf32>
    %c0_23 = arith.constant 0 : index
    %c0_24 = arith.constant 0 : index
    %c0_25 = arith.constant 0 : index
    %41 = vector.load %arg2[%c0_23, %c0_24, %c0_25] : memref<1x4x1xf32, #tpu.memory_space<vmem>>, vector<1x4x1xf32>
    %c0_26 = arith.constant 0 : index
    %c0_27 = arith.constant 0 : index
    %c0_28 = arith.constant 0 : index
    %42 = vector.load %arg3[%c0_26, %c0_27, %c0_28] : memref<1x4x1xf32, #tpu.memory_space<vmem>>, vector<1x4x1xf32>
    %43 = arith.mulf %40, %36 : vector<1x4x1xf32>
    %cst_29 = arith.constant 1.000000e+00 : f32
    %44 = vector.broadcast %cst_29 : f32 to vector<1x4x1xf32>
    %45 = arith.subf %44, %40 : vector<1x4x1xf32>
    %46 = vector.broadcast %39 : vector<1x1x1xf32> to vector<1x4x1xf32>
    %47 = arith.mulf %45, %46 : vector<1x4x1xf32>
    %48 = arith.addf %43, %47 : vector<1x4x1xf32>
    %49 = arith.mulf %8, %36 : vector<1x4x1xf32>
    %50 = arith.mulf %40, %49 : vector<1x4x1xf32>
    %cst_30 = arith.constant 1.000000e+00 : f32
    %51 = vector.broadcast %cst_30 : f32 to vector<1x4x1xf32>
    %52 = arith.subf %51, %40 : vector<1x4x1xf32>
    %53 = arith.mulf %21, %39 : vector<1x1x1xf32>
    %54 = vector.broadcast %53 : vector<1x1x1xf32> to vector<1x4x1xf32>
    %55 = arith.mulf %52, %54 : vector<1x4x1xf32>
    %56 = arith.addf %50, %55 : vector<1x4x1xf32>
    %57 = arith.mulf %41, %48 : vector<1x4x1xf32>
    %58 = arith.mulf %41, %56 : vector<1x4x1xf32>
    %59 = arith.subf %42, %58 : vector<1x4x1xf32>
    %c0_31 = arith.constant 0 : index
    %c0_32 = arith.constant 0 : index
    %c0_33 = arith.constant 0 : index
    %60 = vector.load %arg1[%c0_31, %c0_32, %c0_33] : memref<1x4x256xf32, #tpu.memory_space<vmem>>, vector<1x4x256xf32>
    %61 = vector.broadcast %57 : vector<1x4x1xf32> to vector<1x4x256xf32>
    %62 = arith.mulf %60, %61 : vector<1x4x256xf32>
    %63 = vector.broadcast %59 : vector<1x4x1xf32> to vector<1x4x256xf32>
    %64 = arith.addf %62, %63 : vector<1x4x256xf32>
    %c0_34 = arith.constant 0 : index
    %c0_35 = arith.constant 0 : index
    %c0_36 = arith.constant 0 : index
    %65 = vector.load %arg5[%c0_34, %c0_35, %c0_36] : memref<1x4x256xf32, #tpu.memory_space<vmem>>, vector<1x4x256xf32>
    tpu.vector_store %arg5[%c0_34, %c0_35, %c0_36], %64 {strides = array<i32>} : memref<1x4x256xf32, #tpu.memory_space<vmem>>, vector<1x4x256xf32>,
    return
  }
  func.func @transform_0(%arg0: i32) -> (i32, i32, i32) {
    %c0_i32 = arith.constant 0 : i32
    %c0_i32_0 = arith.constant 0 : i32
    %c0_i32_1 = arith.constant 0 : i32
    return %arg0, %c0_i32, %c0_i32_0 : i32, i32, i32
  }
  func.func @transform_1(%arg0: i32) -> (i32, i32, i32) {
    %c0_i32 = arith.constant 0 : i32
    %c0_i32_0 = arith.constant 0 : i32
    %c0_i32_1 = arith.constant 0 : i32
    return %arg0, %c0_i32, %c0_i32_0 : i32, i32, i32
  }
  func.func @transform_2(%arg0: i32) -> (i32, i32, i32) {
    %c0_i32 = arith.constant 0 : i32
    %c0_i32_0 = arith.constant 0 : i32
    %c0_i32_1 = arith.constant 0 : i32
    return %arg0, %c0_i32, %c0_i32_0 : i32, i32, i32
  }
  func.func @transform_3(%arg0: i32) -> (i32, i32, i32) {
    %c0_i32 = arith.constant 0 : i32
    %c0_i32_0 = arith.constant 0 : i32
    %c0_i32_1 = arith.constant 0 : i32
    %c0_i32_2 = arith.constant 0 : i32
    return %c0_i32, %c0_i32_0, %c0_i32_1 : i32, i32, i32
  }
  func.func @transform_4(%arg0: i32) -> (i32, i32, i32) {
    %c0_i32 = arith.constant 0 : i32
    %c0_i32_0 = arith.constant 0 : i32
    %c0_i32_1 = arith.constant 0 : i32
    return %arg0, %c0_i32, %c0_i32_0 : i32, i32, i32
  }
}

</mosaic_0001>

<bundles_post_ra>
// kernel: tpu_custom_call.1
= control target key start
LH: loop header
LB: loop body
LE: loop exit
PB: predicated region body
PF: predicated region fallthrough
CT: control target
= control target key end

     0   :  { %9 = vsyncpa [#allocation3], 0  ;;  %s701_s0 = inlined_call_operand.vmem [shape: f32[2,4,256], index: 0, kind: input, shape index: {}]   ;;  %s702_s1 = inlined_call_operand.vmem [shape: f32[2,4,1], index: 1, kind: input, shape index: {}]   ;;  %s703_s2 = inlined_call_operand.vmem [shape: f32[2,4,1], index: 2, kind: input, shape index: {}]   ;;  %s704_s3 = inlined_call_operand.vmem [shape: f32[1,4,1], index: 3, kind: input, shape index: {}]   ;;  %s705_s4 = inlined_call_operand.hbm [shape: f32[2,4,256], index: 4, kind: output, shape index: {}]  }
   0x1   :  { %11 = vsyncpa [#allocation3 + $0x1], 0  ;;  %s574_s15 = smov 0   ;;  %s576_s16 = smov 0  }
   0x2   :  { %s578_s17 = smov 0   ;;  %s580_s18 = smov 0  }
   0x3 LB: > { %s595_s19 = sadd.s32 4294967295, %s544_s18   ;;  %s418_s20 = sadd.s32 4294967294, %s544_s18   ;;  %s544_s18 = sphi %s580_s18, %s711_s18   ;;  %s540_s17 = sphi %s578_s17, %s710_s17   ;;  %s536_s16 = sphi %s576_s16, %s709_s16   ;;  %s532_s15 = sphi %s574_s15, %s708_s15  }
   0x4   : > { %s599_s21 = sadd.s32 1, %s544_s18   ;;  %s123_s22 = sadd.s32 1, %s540_s17 }
   0x5   : > { %s120_s23 = ssub.s32 %s544_s18, %s599_s21  ;;  %p133_p0 = scmp.ne.s32.totalorder %s540_s17, %s536_s16 }
   0x6   : > { %p121_p1 = scmp.eq.s32.totalorder %s120_s23, 0  ;;  %p134_p2 = scmp.eq.s32.totalorder %s595_s19, 1 }
   0x7   : > { %p139_p3 = scmp.ne.s32.totalorder %s536_s16, %s532_s15  ;;  %p140_p4 = scmp.eq.s32.totalorder %s418_s20, 1 }
   0x8   : > { %s610_s24 = scalar_select %p121_p1, %s540_s17, %s123_s22  }
   0x9   : > { %p612_p5 = por %p134_p2, %p133_p0  ;;  %p616_p6 = por %p140_p4, %p139_p3 }
   0xa   : > { %p421_p7 = scmp.ge.s32.totalorder %s544_s18, 1  ;;  %p183_p8 = scmp.lt.s32.totalorder %s544_s18, 3 }
   0xc   : > { %p184_p9 = pnand %p421_p7, %p183_p8 }
   0xd   : > { %p217_p10 = scmp.lt.s32.totalorder (!%p184_p9), %s595_s19, 1  ;;  %vm234_vm0 = vcmask (!%p184_p9), 1043456   ;;  %v546_v10 = vmov (!%p184_p9), 0   ;;  %v278_v41 = vld [vmem:[%s704_s3] sm:$0xf] (!%p184_p9)  ;;  %v300_v59 = vlaneseq (!%p184_p9)  ;;  %s214_s20 = sand.u32 (!%p184_p9), 1, %s536_s16  }
   0xe   : > { %187 = sbr.rel (%p184_p9) target bundleno = 367 (0x16f), region = 36  ;;  %475 = vset.pattern.permute.xlu1 (!%p184_p9), %v546_v10  ;;  %476 = vset.pattern.permute.xlu0 (!%p184_p9), %v546_v10  ;;  %v282_v42 = vsub.f32 (!%p184_p9), 1.0, %v278_v41  ;;  %v547_v57 = vmov (!%p184_p9), 839922192   ;;  %s422_s22 = sshll.u32 (!%p184_p9), %s214_s20, 3 }
   0xf   : > { %v298_v58 = vunpack.c.l.s4 (!%p184_p9), %v547_v57  ;;  %v301_v61 = vshrl.u32 (!%p184_p9), %v300_v59, 7  ;;  %s433_s23 = sshll.u32 (!%p184_p9), %s595_s19, 7 }
  0x11   : > { %v299_v60 = vunpack.c.0.s8 (!%p184_p9), %v298_v58 }
  0x13   : > { %v302_v62 = vsub.s32 (!%p184_p9), %v299_v60, %v301_v61 }
  0x15   : > { %s624_s27 = scalar_select %p217_p10, %s595_s19, 1 }
  0x16   : > { %s548_s19 = smov [#allocation2]  }
  0x17   : > { %s432_s28 = sshll.u32 %s624_s27, 3  ;;  %s425_s6 = sshll.u32 %s624_s27, 2 }
  0x18   : > { %s221_s5 = scalar_lea.vmem %s701_s0, %s432_s28  ;;  %s225_s11 = scalar_lea.vmem %s702_s1, %s425_s6 }
  0x19   : > { %v630_v0 = vld [vmem:[%s221_s5] sm:$0xff]  ;;  %s229_s14 = scalar_lea.vmem %s703_s2, %s425_s6  ;;  %s216_s27 = scalar_lea.vmem [#allocation2], %s422_s22 }
  0x1a   : > { %v232_v1 = vcombine.high %v630_v0, %v630_v0  ;;  %v235_v2 = vsel %vm234_vm0, %v630_v0, 0.0  ;;  %v240_v3 = vmul.f32 %v630_v0, %v630_v0  ;;  %v279_v48 = vld [vmem:[%s225_s11] sm:$0xf]  ;;  %s335_s28 = sshll.u32 %s216_s27, 4  ;;  %s659_s5 = scalar_lea.hbm %s705_s4, %s433_s23  ;;  %s661_s28 = int_to_ptr.vmem [resolvable:$true] %s335_s28 }
  0x1b   : > { %v280_v54 = vld [vmem:[%s229_s14] sm:$0xf]  ;;  %s321_s6 = scalar_lea.sflag [#allocation3], %s214_s20  ;;  %s482_s7 = scalar_lea.vmem %s661_s28, 128 }
  0x1c   : > { %v236_v4 = vsel %vm234_vm0, %v232_v1, 0.0  ;;  %v242_v5 = vcombine.high %v240_v3, %v240_v3  ;;  %v244_v6 = vsel %vm234_vm0, %v240_v3, 0.0  ;;  %p483_p11 = scmp.ne.s32.totalorder %s661_s28, %s482_s7  ;;  %s486_s8 = sshll.u32 %s548_s19, 4  ;;  %s487_s8 = int_to_ptr.vmem [resolvable:$false] %s486_s8 }
  0x1d   : > { %v237_v7 = vadd.f32 %v236_v4, %v235_v2  ;;  %s488_s9 = scalar_lea.vmem %s487_s8, 256  ;;  %p489_p0 = scmp.lt.s32.totalorder %s661_s28, %s487_s8 }
  0x1e   : > { %v245_v8 = vsel %vm234_vm0, %v242_v5, 0.0  ;;  %p484_p12 = pnand %p483_p11, %p612_p5  ;;  %p490_p1 = scmp.lt.s32.totalorder %s488_s9, %s482_s7 }
  0x1f   : > { %238 = vadd.xlane.f32.xlu0 %v237_v7  ;;  %v246_v9 = vadd.f32 %v245_v8, %v244_v6 }
  0x20   : > { %p485_p13 = pneg %p484_p12  ;;  %p491_p2 = por %p490_p1, %p489_p0 }
  0x22   : > { %p492_p3 = pnand %p491_p2, %p485_p13 }
  0x23   : > { %247 = vadd.xlane.f32.xlu0 %v246_v9 }
  0xac   : > { %v239_v11 = vpop.xlane.xlu0 %238 }
  0xad   : > { %v249_v12 = vmul.f32 0.00390625, %v239_v11  ;;  %v254_v13 = vsel %vm234_vm0, %v239_v11, 0.0 }
  0xae   : > { %v255_v14 = vrot.slane %v254_v13, 4 }
  0xaf   : > { %v250_v16 = vmul.f32 %v249_v12, %v239_v11 }
  0xb0   : > { %v256_v15 = vadd.f32 %v255_v14, %v254_v13  ;;  %v248_v17 = vpop.xlane.xlu0 %247 }
  0xb1   : > { %v262_v18 = vsel %vm234_vm0, %v248_v17, 0.0  ;;  %v251_v22 = vsub.f32 %v248_v17, %v250_v16 }
  0xb2   : > { %v257_v19 = vrot.slane %v256_v15, 2  ;;  %v263_v20 = vrot.slane %v262_v18, 4 }
  0xb3   : > { %v252_v27 = vmax.f32 %v251_v22, 0.0 }
  0xb4   : > { %v258_v21 = vadd.f32 %v257_v19, %v256_v15  ;;  %v264_v23 = vadd.f32 %v263_v20, %v262_v18 }
  0xb5   : > { %v253_v32 = vmul.f32 0.003921569, %v252_v27 }
  0xb6   : > { %v259_v24 = vrot.slane %v258_v21, 1  ;;  %v265_v25 = vrot.slane %v264_v23, 2 }
  0xb7   : > { %v274_v36 = vadd.f32 1e-05, %v253_v32 }
  0xb8   : > { %v260_v26 = vadd.f32 %v259_v24, %v258_v21  ;;  %v266_v28 = vadd.f32 %v265_v25, %v264_v23 }
  0xb9   : > { %478 = vrsqrt.f32 %v274_v36 }
  0xba   : > { %v261_v29 = vmul.f32 0.0009765625, %v260_v26  ;;  %v267_v30 = vrot.slane %v266_v28, 1 }
  0xbc   : > { %v269_v31 = vmul.f32 1024.0, %v261_v29  ;;  %v268_v34 = vadd.f32 %v267_v30, %v266_v28 }
  0xbe   : > { %v270_v33 = vmul.f32 %v269_v31, %v261_v29 }
  0xc0   : > { %v271_v35 = vsub.f32 %v268_v34, %v270_v33 }
  0xc2   : > { %v272_v37 = vmax.f32 %v271_v35, 0.0 }
  0xc3   : > { %v479_v40 = vpop.eup %478 }
  0xc4   : > { %v273_v38 = vmul.f32 0.0009775171, %v272_v37  ;;  %v285_v43 = vmul.f32 %v479_v40, %v249_v12  ;;  %v281_v45 = vmul.f32 %v479_v40, %v278_v41 }
  0xc6   : > { %v276_v39 = vadd.f32 1e-05, %v273_v38  ;;  %v286_v50 = vmul.f32 %v285_v43, %v278_v41 }
  0xc8   : > { %480 = vrsqrt.f32 %v276_v39 }
  0xd2   : > { %v481_v44 = vpop.eup %480 }
  0xd3   : > { %v283_v46 = vmul.f32 %v481_v44, %v282_v42  ;;  %v287_v47 = vmul.f32 %v481_v44, %v261_v29 }
  0xd5   : > { %v284_v49 = vadd.f32 %v283_v46, %v281_v45  ;;  %v288_v51 = vmul.f32 %v287_v47, %v282_v42 }
  0xd7   : > { %v289_v52 = vadd.f32 %v288_v51, %v286_v50  ;;  %v290_v53 = vmul.f32 %v284_v49, %v279_v48 }
  0xd9   : > { %v291_v55 = vmul.f32 %v289_v52, %v279_v48  ;;  %295 = vperm.xlu1 %475, %v290_v53  }
  0xdb   : > { %v292_v56 = vsub.f32 %v280_v54, %v291_v55 }
  0xdd   : > { %308 = vperm.xlu1 %475, %v292_v56  }
 0x158   : > { %v296_v63 = vpop.permute.xlu1 %295 }
 0x159   : > { %v303_v1 = vrot.slane %v296_v63, %v302_v62 }
 0x15b   : > { %v305_v3 = vmul.f32 %v303_v1, %v630_v0 }
 0x15c   : > { %v309_v2 = vpop.permute.xlu1 %308 }
 0x15d   : > { %v316_v4 = vrot.slane %v309_v2, %v302_v62 }
 0x15f   : > { %v318_v5 = vadd.f32 %v316_v4, %v305_v3 }
 0x161   : > { %319 = vst [vmem:[%s216_s27] sm:$0xff] %v318_v5 }
 0x162   : > { %495 = shalt.err (!%p492_p3)
}
 0x163   : > { %s496_s10 = scalar_lea.hbm %s659_s5, 128  ;;  %s500_s13 = scalar_lea.hbm %s705_s4, 256 }
 0x164   : > { %p497_p4 = scmp.ne.s32.totalorder %s659_s5, %s496_s10  ;;  %p501_p9 = scmp.lt.u32.totalorder %s659_s5, %s705_s4 }
 0x165   : > { %p502_p10 = scmp.lt.u32.totalorder %s500_s13, %s496_s10  ;;  %p504_p12 = scmp.lt.u32.totalorder %s496_s10, %s659_s5 }
 0x166   : > { %p498_p7 = pnand %p497_p4, %p612_p5 }
 0x167   : > { %p503_p11 = por %p502_p10, %p501_p9 }
 0x168   : > { %p499_p8 = pneg %p498_p7 }
 0x169   : > { %p505_p13 = por %p504_p12, %p503_p11 }
 0x16b   : > { %p506_p0 = pnand %p505_p13, %p499_p8 }
 0x16d   : > { %509 = shalt.err (!%p506_p0)
}
 0x16e   : > { %434 = dma.vmem_to_hbm [thread:$0]  (%p612_p5), %s661_s28, 128, %s659_s5, %s321_s6  }
 0x16f PF: > { %p440_p1 = scmp.ge.s32.totalorder %s544_s18, 2  ;;  %s347_s22 = sand.u32 1, %s532_s15  }
 0x170   : > { %s348_s23 = scalar_lea.sflag [#allocation3], %s347_s22 }
 0x171   : > { %p437_p2 = pnand %p440_p1, %p616_p6 }
 0x173   : > { %527 = dma.done.wait (!%p437_p2), %s348_s23, 128  }
 0x174   : > { %529 = vsyncadd (!%p437_p2), %s348_s23, 4294967168  ;;  %p14_p3 = scmp.ge.s32.totalorder %s599_s21, 4   ;;  %s708_s15 = smov %s536_s16 }
 0x175   : > { %s709_s16 = smov %s540_s17  ;;  %s710_s17 = smov %s610_s24 }
 0x176   : > { %s711_s18 = smov %s599_s21  ;;  %16 = sbr.rel (!%p14_p3) target bundleno = 3 (0x3), region = 77 }
 0x17d   :  { %353 = vsyncpa [#allocation3], 1 }
 0x17e   :  { %355 = vsyncpa [#allocation3 + $0x1], 1 }

</bundles_post_ra>
